<compile_context>
chip_gen: v5e
topology: v5e:2x2
jax: 0.10.0
libtpu: 0.0.40
codegen_flags: <defaults>
</compile_context>

<pallas_src>
import functools

import jax
import jax.numpy as jnp
from jax.experimental import pallas as pl
from jax.experimental.pallas import tpu as pltpu

_NEG = -1e30  # finite "minus infinity" for padded class columns


# --------------------------------------------------------------------------- #
# helpers
# --------------------------------------------------------------------------- #
def _round_up(n, m):
    return (n + m - 1) // m * m


def _pick_tile(n, cap, mult):
    """Largest t <= cap with n % t == 0 and t % mult == 0; else the full n."""
    if n <= cap:
        return n
    for t in range(cap, 0, -1):
        if n % t == 0 and t % mult == 0:
            return t
    return n


def _ce_sum(logits, onehot):
    """sum over rows of ( logsumexp(logits) - <onehot, logits> ).  f32 in/out."""
    m = jnp.max(logits, axis=1, keepdims=True)
    lse = m + jnp.log(jnp.sum(jnp.exp(logits - m), axis=1, keepdims=True))
    picked = jnp.sum(onehot * logits, axis=1, keepdims=True)
    return jnp.sum(lse - picked)


def _label_onehot(lab_col, shape):
    col = jax.lax.broadcasted_iota(jnp.int32, shape, 1)
    return (col == lab_col).astype(jnp.float32)


# --------------------------------------------------------------------------- #
# kernels
# --------------------------------------------------------------------------- #
def _cls_only_kernel(cls_ref, lab_ref, out_ref, *, B):
    """distil_type == 'none': mean cross-entropy only (teacher never runs)."""
    cls_logit = cls_ref[...]
    onehot = _label_onehot(lab_ref[...], cls_logit.shape)
    part = _ce_sum(cls_logit, onehot) / float(B)
    out_ref[...] = jnp.broadcast_to(part.reshape(1, 1, 1),
                                    out_ref.shape).astype(out_ref.dtype)


def _distill_kernel(x_ref, wt_ref, bt_ref, cls_ref, dist_ref, lab_ref,
                    out_ref, acc_ref, *, distil_type, lamb, tau, B, K, Kp):
    k = pl.program_id(1)

    @pl.when(k == 0)
    def _init():
        acc_ref[...] = jnp.zeros_like(acc_ref)

    # Streamed teacher matmul: bf16 operands, f32 accumulation on the MXU.
    acc_ref[...] += jnp.dot(x_ref[...], wt_ref[...],
                            preferred_element_type=jnp.float32)

    @pl.when(k == pl.num_programs(1) - 1)
    def _epilogue():
        teacher_logit = acc_ref[...] + bt_ref[...]      # (tb, Kp) f32
        cls_logit = cls_ref[...]                        # (tb, Kp) f32 (pads=-1e30)
        dist = dist_ref[...]                            # (tb, Kp) f32 (pads=-1e30)
        lab_col = lab_ref[...]                          # (tb, 1)  int32

        # classification loss: CrossEntropyLoss(cls_logit, label), mean over B
        onehot = _label_onehot(lab_col, cls_logit.shape)
        cls_part = _ce_sum(cls_logit, onehot) / float(B)

        if distil_type == 'soft':
            # F.kl_div(softmax(d/tau), softmax(t/tau), 'sum', log_target=False)
            #   = sum( q * (log q - p) ),  p = softmax(d/tau), q = softmax(t/tau)
            zt = teacher_logit / tau
            zd = dist / tau
            tm = jnp.max(zt, axis=1, keepdims=True)
            t_lse = tm + jnp.log(jnp.sum(jnp.exp(zt - tm), axis=1, keepdims=True))
            lq = zt - t_lse                    # log softmax(teacher/tau)
            q = jnp.exp(lq)
            dm = jnp.max(zd, axis=1, keepdims=True)
            d_lse = dm + jnp.log(jnp.sum(jnp.exp(zd - dm), axis=1, keepdims=True))
            p = jnp.exp(zd - d_lse)            # softmax(dist/tau) (probabilities)
            kl = jnp.sum(q * (lq - p))         # padded cols: q == 0 -> contribute 0
            dist_part = kl * (tau * tau) / float(B * K)
        else:  # 'hard'
            col = jax.lax.broadcasted_iota(jnp.int32, teacher_logit.shape, 1)
            tmax = jnp.max(teacher_logit, axis=1, keepdims=True)
            first_max = jnp.min(
                jnp.where(teacher_logit == tmax, col, jnp.int32(Kp)),
                axis=1, keepdims=True)         # torch argmax tie-break (first max)
            hard_onehot = (col == first_max).astype(jnp.float32)
            dist_part = _ce_sum(dist, hard_onehot) / float(B)

        part = (1.0 - lamb) * cls_part + lamb * dist_part
        out_ref[...] = jnp.broadcast_to(part.reshape(1, 1, 1),
                                        out_ref.shape).astype(out_ref.dtype)


# --------------------------------------------------------------------------- #
# wrapper
# --------------------------------------------------------------------------- #
def distillation_loss(input_nchw, cls_logit, distil_logit, label,
                      teacher_w, teacher_b, *, distil_type='soft',
                      lamb=0.5, tau=2.0, b_tile_cap=128, f_tile_cap=512):
    """Pallas-backed DistillationLoss.forward. Returns a scalar f32 loss."""
    assert distil_type in ('none', 'soft', 'hard')
    B = input_nchw.shape[0]
    F = input_nchw.shape[1] * input_nchw.shape[2] * input_nchw.shape[3]
    K = cls_logit.shape[1]
    Kp = max(128, _round_up(K, 128))           # lane-dense class axis
    pad = Kp - K

    # glue: pad class axis (pads = -1e30 so they vanish in max/LSE/softmax)
    cls_p = jnp.pad(cls_logit.astype(jnp.float32), ((0, 0), (0, pad)),
                    constant_values=_NEG)
    lab_col = label.astype(jnp.int32).reshape(B, 1)

    tb = _pick_tile(B, b_tile_cap, 8)
    nb = B // tb
    out_shape = jax.ShapeDtypeStruct((nb, 8, 128), jnp.float32)

    if distil_type == 'none':
        out = pl.pallas_call(
            functools.partial(_cls_only_kernel, B=B),
            out_shape=out_shape,
            grid_spec=pltpu.PrefetchScalarGridSpec(
                num_scalar_prefetch=0,
                grid=(nb,),
                in_specs=[pl.BlockSpec((tb, Kp), lambda i: (i, 0)),
                          pl.BlockSpec((tb, 1), lambda i: (i, 0))],
                out_specs=pl.BlockSpec((1, 8, 128), lambda i: (i, 0, 0)),
            ),
            compiler_params=pltpu.CompilerParams(
                dimension_semantics=("parallel",)),
        )(cls_p, lab_col)
        return jnp.sum(out[:, 0, 0])

    # glue: flatten NCHW, bf16 weight/input streams, pad class axis of W/bias
    dist_p = jnp.pad(distil_logit.astype(jnp.float32), ((0, 0), (0, pad)),
                     constant_values=_NEG)
    x_flat = input_nchw.reshape(B, F).astype(jnp.bfloat16)
    w_p = jnp.pad(teacher_w.astype(jnp.bfloat16), ((0, 0), (0, pad)))
    b_p = jnp.pad(teacher_b.astype(jnp.float32), (0, pad),
                  constant_values=_NEG).reshape(1, Kp)

    tf = _pick_tile(F, f_tile_cap, 128)        # F-tile sized for default VMEM
    nf = F // tf

    kernel = functools.partial(_distill_kernel, distil_type=distil_type,
                               lamb=float(lamb), tau=float(tau),
                               B=B, K=K, Kp=Kp)
    out = pl.pallas_call(
        kernel,
        out_shape=out_shape,
        grid_spec=pltpu.PrefetchScalarGridSpec(
            num_scalar_prefetch=0,
            grid=(nb, nf),                      # B parallel (outer), F reduction (inner)
            in_specs=[
                pl.BlockSpec((tb, tf), lambda i, k: (i, k)),   # x (bf16)
                pl.BlockSpec((tf, Kp), lambda i, k: (k, 0)),   # W (bf16)
                pl.BlockSpec((1, Kp), lambda i, k: (0, 0)),    # bias (f32)
                pl.BlockSpec((tb, Kp), lambda i, k: (i, 0)),   # cls logits
                pl.BlockSpec((tb, Kp), lambda i, k: (i, 0)),   # distil logits
                pl.BlockSpec((tb, 1), lambda i, k: (i, 0)),    # labels (int32)
            ],
            out_specs=pl.BlockSpec((1, 8, 128), lambda i, k: (i, 0, 0)),
            scratch_shapes=[pltpu.VMEM((tb, Kp), jnp.float32)],
        ),
        compiler_params=pltpu.CompilerParams(
            dimension_semantics=("parallel", "arbitrary")),
    )(x_flat, w_p, b_p, cls_p, dist_p, lab_col)
    return jnp.sum(out[:, 0, 0])


# --------------------------------------------------------------------------- #
# pure-JAX reference mirroring the PyTorch module (for validation)
# --------------------------------------------------------------------------- #
def _reference(input_nchw, cls_logit, distil_logit, label, teacher_w, teacher_b,
               distil_type, lamb, tau):
    B, K = cls_logit.shape

    def lse(z):
        m = jnp.max(z, axis=1)
        return m + jnp.log(jnp.sum(jnp.exp(z - m[:, None]), axis=1))

    onehot = jax.nn.one_hot(label, K, dtype=jnp.float32)
    cls_loss = jnp.mean(lse(cls_logit) - jnp.sum(onehot * cls_logit, axis=1))
    if distil_type == 'none':
        return cls_loss

    x_flat = input_nchw.reshape(B, -1).astype(jnp.bfloat16)
    teacher_logit = jnp.dot(x_flat, teacher_w.astype(jnp.bfloat16),
                            preferred_element_type=jnp.float32) + teacher_b[None, :]
    if distil_type == 'soft':
        p = jax.nn.softmax(distil_logit / tau, axis=1)
        q = jax.nn.softmax(teacher_logit / tau, axis=1)
        distil = jnp.sum(q * (jnp.log(q) - p)) * tau * tau / (B * K)
    else:
        hard = jnp.argmax(teacher_logit, axis=1)
        oh = jax.nn.one_hot(hard, K, dtype=jnp.float32)
        distil = jnp.mean(lse(distil_logit) - jnp.sum(oh * distil_logit, axis=1))
    return (1.0 - lamb) * cls_loss + lamb * distil


# --------------------------------------------------------------------------- #
if __name__ == "__main__":
    # small deterministic setup
    B, C, H, W = 8, 4, 16, 16
    K = 32                      # num_classes
    F = C * H * W
    lamb, tau = 0.5, 2.0

    key = jax.random.PRNGKey(0)
    k_x, k_cls, k_dst, k_lab, k_w, k_b = jax.random.split(key, 6)

    x = jax.random.normal(k_x, (B, C, H, W), dtype=jnp.float32)
    cls_logit = jax.random.normal(k_cls, (B, K), dtype=jnp.float32)
    distil_logit = jax.random.normal(k_dst, (B, K), dtype=jnp.float32)
    label = jax.random.randint(k_lab, (B,), 0, K, dtype=jnp.int32)

    # deterministic synthetic teacher (bf16 linear classifier over flattened input)
    teacher_w = (0.02 * jax.random.normal(k_w, (F, K), dtype=jnp.float32)
                 ).astype(jnp.bfloat16)
    teacher_b = 0.01 * jax.random.normal(k_b, (K,), dtype=jnp.float32)

    ok = True
    for dtype_ in ('none', 'soft', 'hard'):
        got = distillation_loss(x, cls_logit, distil_logit, label,
                                teacher_w, teacher_b,
                                distil_type=dtype_, lamb=lamb, tau=tau)
        got = jax.block_until_ready(got)
        want = _reference(x, cls_logit, distil_logit, label,
                          teacher_w, teacher_b, dtype_, lamb, tau)
        if not bool(jnp.allclose(got, want, rtol=1e-4, atol=1e-4)):
            ok = False
            print(f"MISMATCH [{dtype_}]: pallas={got} ref={want}")

    if ok:
        print("KERNEL_OK")
</pallas_src>

<mosaic_0001>
module attributes {stable_mosaic.version = 11 : i64} {
  func.func @_cls_only_kernel(%arg0: i32, %arg1: memref<8x128xf32, #tpu.memory_space<vmem>>, %arg2: memref<8x1xi32, #tpu.memory_space<vmem>>, %arg3: memref<1x8x128xf32, #tpu.memory_space<vmem>>) attributes {dimension_semantics = [#tpu.dimension_semantics<parallel>], iteration_bounds = array<i64: 1>, scalar_prefetch = 0 : i64, scratch_operands = 0 : i64, tpu.core_type = #tpu.core_type<tc>, window_params = [{transform_indices = @transform_0, window_bounds = array<i64: 8, 128>}, {transform_indices = @transform_1, window_bounds = array<i64: 8, 1>}, {transform_indices = @transform_2, window_bounds = array<i64: 1, 8, 128>}]} {
    %c0 = arith.constant 0 : index
    %c0_0 = arith.constant 0 : index
    %0 = vector.load %arg1[%c0, %c0_0] : memref<8x128xf32, #tpu.memory_space<vmem>>, vector<8x128xf32>
    %c0_1 = arith.constant 0 : index
    %c0_2 = arith.constant 0 : index
    %1 = vector.load %arg2[%c0_1, %c0_2] : memref<8x1xi32, #tpu.memory_space<vmem>>, vector<8x1xi32>
    %2 = tpu.iota {dimensions = array<i32: 1>} : vector<8x128xi32>
    %3 = vector.broadcast %1 : vector<8x1xi32> to vector<8x128xi32>
    %4 = arith.cmpi eq, %2, %3 : vector<8x128xi32>
    %5 = arith.extui %4 : vector<8x128xi1> to vector<8x128xi32>
    %6 = arith.sitofp %5 : vector<8x128xi32> to vector<8x128xf32>
    %cst = arith.constant dense<0xFF800000> : vector<8xf32>
    %7 = vector.multi_reduction <maximumf>, %0, %cst [1] : vector<8x128xf32> to vector<8xf32>
    %8 = vector.shape_cast %7 : vector<8xf32> to vector<8x1xf32>
    %9 = vector.broadcast %8 : vector<8x1xf32> to vector<8x128xf32>
    %10 = arith.subf %0, %9 : vector<8x128xf32>
    %11 = math.exp %10 : vector<8x128xf32>
    %cst_3 = arith.constant dense<0.000000e+00> : vector<8xf32>
    %12 = vector.multi_reduction <add>, %11, %cst_3 [1] : vector<8x128xf32> to vector<8xf32>
    %13 = vector.shape_cast %12 : vector<8xf32> to vector<8x1xf32>
    %14 = math.log %13 : vector<8x1xf32>
    %15 = arith.addf %8, %14 : vector<8x1xf32>
    %16 = arith.mulf %6, %0 : vector<8x128xf32>
    %cst_4 = arith.constant dense<0.000000e+00> : vector<8xf32>
    %17 = vector.multi_reduction <add>, %16, %cst_4 [1] : vector<8x128xf32> to vector<8xf32>
    %18 = vector.shape_cast %17 : vector<8xf32> to vector<8x1xf32>
    %19 = arith.subf %15, %18 : vector<8x1xf32>
    %20 = vector.shape_cast %19 : vector<8x1xf32> to vector<1x8x1xf32>
    %cst_5 = arith.constant dense<0.000000e+00> : vector<1xf32>
    %21 = vector.multi_reduction <add>, %20, %cst_5 [1, 2] : vector<1x8x1xf32> to vector<1xf32>
    %22 = vector.shape_cast %21 : vector<1xf32> to vector<1x1x1xf32>
    %23 = vector.extract %22[0, 0, 0] : f32 from vector<1x1x1xf32>
    %cst_6 = arith.constant 8.000000e+00 : f32
    %24 = arith.divf %23, %cst_6 : f32
    %25 = vector.broadcast %24 : f32 to vector<1x1x1xf32>
    %26 = vector.shape_cast %25 : vector<1x1x1xf32> to vector<1x1x1xf32>
    %27 = vector.broadcast %26 : vector<1x1x1xf32> to vector<1x8x128xf32>
    %c0_7 = arith.constant 0 : index
    %c0_8 = arith.constant 0 : index
    %c0_9 = arith.constant 0 : index
    %28 = vector.load %arg3[%c0_7, %c0_8, %c0_9] : memref<1x8x128xf32, #tpu.memory_space<vmem>>, vector<1x8x128xf32>
    tpu.vector_store %arg3[%c0_7, %c0_8, %c0_9], %27 {strides = array<i32>} : memref<1x8x128xf32, #tpu.memory_space<vmem>>, vector<1x8x128xf32>,
    return
  }
  func.func @transform_0(%arg0: i32) -> (i32, i32) {
    %c0_i32 = arith.constant 0 : i32
    %c0_i32_0 = arith.constant 0 : i32
    return %arg0, %c0_i32 : i32, i32
  }
  func.func @transform_1(%arg0: i32) -> (i32, i32) {
    %c0_i32 = arith.constant 0 : i32
    %c0_i32_0 = arith.constant 0 : i32
    return %arg0, %c0_i32 : i32, i32
  }
  func.func @transform_2(%arg0: i32) -> (i32, i32, i32) {
    %c0_i32 = arith.constant 0 : i32
    %c0_i32_0 = arith.constant 0 : i32
    %c0_i32_1 = arith.constant 0 : i32
    return %arg0, %c0_i32, %c0_i32_0 : i32, i32, i32
  }
}

</mosaic_0001>

<bundles_post_ra>
// kernel: tpu_custom_call.1
= control target key start
LH: loop header
LB: loop body
LE: loop exit
PB: predicated region body
PF: predicated region fallthrough
CT: control target
= control target key end

     0   :  { %s144_s0 = inlined_call_operand.vmem [shape: f32[8,128], index: 0, kind: input, shape index: {}]   ;;  %s145_s1 = inlined_call_operand.vmem [shape: s32[8,1], index: 1, kind: input, shape index: {}]   ;;  %s146_s2 = inlined_call_operand.hbm [shape: f32[1,8,128], index: 2, kind: output, shape index: {}]  }
   0x1   :  { %v12_v0 = vld [vmem:[%s144_s0] sm:$0xff] }
   0x2   :  { %7 = vsyncpa [#allocation3], 0  ;;  %22 = vmax.xlane.f32.xlu0 %v12_v0  ;;  %v116_v1 = vmov 0   ;;  %v13_v2 = vld [vmem:[%s145_s1] sm:$0xff]  ;;  %v14_v7 = vlaneseq  ;;  %v117_v10 = vmov 0.0   ;;  %vm36_vm1 = vcmask 7168  }
   0x3   :  { %83 = vset.pattern.permute.xlu0 %v116_v1  ;;  %v118_v20 = vmov 8.0   ;;  %s119_s0 = smov [#allocation2]   ;;  %s65_s16 = sshll.u32 %s146_s2, 4  ;;  %s66_s16 = int_to_ptr.hbm [resolvable:$true] %s65_s16 }
   0x4   :  { %v15_v8 = vand.u32 127, %v14_v7  ;;  %s63_s1 = sshll.u32 %s119_s0, 4  ;;  %s64_s1 = int_to_ptr.vmem [resolvable:$true] %s63_s1 }
  0x16   :  { %17 = vperm.xlu0 %83, %v13_v2  }
  0x75   :  { %v23_v3 = vpop.xlane.xlu0 %22 }
  0x76   :  { %v24_v4 = vsub.f32 %v12_v0, %v23_v3 }
  0x78   :  { %v25_v5 = vmul.f32 1.442695, %v24_v4 }
  0x7a   :  { %84 = vpow2.f32 %v25_v5 }
  0x80   :  { %v85_v6 = vpop.eup %84 }
  0x81   :  { %27 = vadd.xlane.f32.xlu1 %v85_v6 }
  0x88   :  { %v18_v9 = vpop.permute.xlu0 %17 }
  0x89   :  { %vm19_vm0 = vcmp.eq.s32.totalorder %v15_v8, %v18_v9 }
  0x8a   :  { %v74_v11 = vsel %vm19_vm0, 1.0, %v117_v10 }
  0x8b   :  { %v32_v12 = vmul.f32 %v74_v11, %v12_v0 }
  0x8d   :  { %33 = vadd.xlane.f32.xlu1 %v32_v12 }
  0xf4   :  { %v28_v13 = vpop.xlane.xlu1 %27 }
  0xf5   :  { %86 = vlog2.f32 %v28_v13 }
  0xf6   :  { %88 = vrcp.f32 %v118_v20 }
  0xfb   :  { %v87_v14 = vpop.eup %86 }
  0xfc   :  { %v30_v15 = vmul.f32 0.6931472, %v87_v14  ;;  %v89_v21 = vpop.eup %88 }
  0xfd   :  { %v48_v22 = vmul.f32 8.0, %v89_v21  ;;  %vm52_vm2 = vweird.f32 %v89_v21 }
  0xfe   :  { %v31_v16 = vadd.f32 %v30_v15, %v23_v3 }
  0xff   :  { %v49_v23 = vsub.f32 1.0, %v48_v22 }
 0x100   :  { %v34_v17 = vpop.xlane.xlu1 %33 }
 0x101   :  { %v35_v18 = vsub.f32 %v31_v16, %v34_v17  ;;  %v50_v27 = vmul.f32 %v89_v21, %v49_v23 }
 0x103   :  { %v37_v19 = vsel %vm36_vm1, %v35_v18, 0.0  ;;  %v51_v30 = vadd.f32 %v89_v21, %v50_v27 }
 0x104   :  { %38 = vadd.xlane.f32.xlu2 %v37_v19 }
 0x105   :  { %v53_v33 = vsel %vm52_vm2, %v89_v21, %v51_v30 }
 0x177   :  { %v39_v24 = vpop.xlane.xlu2 %38 }
 0x178   :  { %v40_v25 = vrot.slane %v39_v24, 4 }
 0x17a   :  { %v41_v26 = vadd.f32 %v40_v25, %v39_v24 }
 0x17c   :  { %v42_v28 = vrot.slane %v41_v26, 2 }
 0x17e   :  { %v43_v29 = vadd.f32 %v42_v28, %v41_v26 }
 0x180   :  { %v44_v31 = vrot.slane %v43_v29, 1 }
 0x182   :  { %v45_v32 = vadd.f32 %v44_v31, %v43_v29 }
 0x184   :  { %75 = vpush %v45_v32 }
 0x185   :  { %77 = vpush %v53_v33 }
 0x1b5   :  { %s76_s13 = spop %75 }
 0x1b6   :  { %s78_s17 = spop %77 }
 0x1b7   :  { %s55_s18 = smul.f32 %s78_s17, %s76_s13 }
 0x1b9   :  { %v56_v34 = vstv %s55_s18 }
 0x1ba   :  { %57 = vst [vmem:[#allocation2] sm:$0xff] %v56_v34 }
 0x1bb   :  { %68 = dma.vmem_to_hbm [thread:$0]  %s64_s1, 128, %s66_s16, [#allocation3]  }
 0x1bc   :  { %114 = dma.done.wait [#allocation3], 128  }
 0x1bd   :  { %115 = vsyncadd [#allocation3], 4294967168 }
 0x1be   :  { %73 = vsyncpa [#allocation3], 1 }

</bundles_post_ra>
